<compile_context>
chip_gen: v7x
topology: tpu7x:2x2x1
jax: 0.10.0
libtpu: 0.0.40
codegen_flags: <defaults>
</compile_context>

<pallas_src>
import functools

import jax
import jax.numpy as jnp
import numpy as np
from jax.experimental import pallas as pl
from jax.experimental.pallas import tpu as pltpu

LN_EPS = 1e-5  # nn.LayerNorm default


# ----------------------------------------------------------------------------- helpers
def _round_up(x, m):
    return ((x + m - 1) // m) * m


def _vmem_capacity_bytes():
    """Physical VMEM per core; conservative 64 MiB (v7x per-TC) fallback if unknown."""
    try:
        cap = int(getattr(pltpu.get_tpu_info(), "vmem_capacity_bytes", 0))
        if cap > 0:
            return cap
    except Exception:
        pass
    return 64 << 20


def _choose_k_tile(d_pad, w_itemsize, resident_budget):
    """Keep W^T fully resident if it fits the budget; otherwise pick the largest K tile
    (multiple of 128 dividing d_pad) whose double-buffered block fits — large tiles keep
    the 256x256 MXU of v6e/v7x fully fed and minimize re-stream overhead."""
    if d_pad * d_pad * w_itemsize <= resident_budget:
        return d_pad
    fitting = [m * 128 for m in range(1, d_pad // 128 + 1)
               if d_pad % (m * 128) == 0
               and 2 * (m * 128) * d_pad * w_itemsize <= resident_budget]
    return max(fitting) if fitting else 128


# ------------------------------------------------------------------------------- kernel
def _ffn_kernel(x_ref, wt_ref, p_ref, o_ref, *scratch,
                d_true, k_tile, num_k, compute_dtype, acc_in_out, needs_mask):
    k = pl.program_id(1)
    last = num_k - 1

    # ---- GEMM (optionally K-tiled): partial = x[:, k*kt:(k+1)*kt] @ W^T[k*kt:(k+1)*kt, :]
    if num_k == 1:
        x_chunk = x_ref[...]
    else:
        off = pl.multiple_of(k * k_tile, 128)
        x_chunk = x_ref[:, pl.ds(off, k_tile)]
    partial = jnp.dot(x_chunk.astype(compute_dtype), wt_ref[...],
                      preferred_element_type=jnp.float32)

    if num_k > 1:
        # Accumulate in the resident f32 output block when possible; otherwise scratch.
        acc_ref = o_ref if acc_in_out else scratch[0]

        @pl.when(k == 0)
        def _init():                       # no zero-init + add round trip
            acc_ref[...] = partial

        if num_k > 2:
            @pl.when(jnp.logical_and(k > 0, k < last))
            def _accum():
                acc_ref[...] += partial

    # ---- Epilogue on the last K step: bias, ReLU, LN1, residual, LN2, store.
    @pl.when(k == last)
    def _epilogue():
        if num_k == 1:
            y = partial
        else:
            y = acc_ref[...] + partial     # last partial consumed in-register, never stored

        bias = p_ref[0:1, :]
        g1, b1 = p_ref[1:2, :], p_ref[2:3, :]
        g2, b2 = p_ref[3:4, :], p_ref[4:5, :]
        lane_mask = p_ref[5:6, :]          # precomputed {1.0, 0.0} row (rides the same DMA)
        inv_d = 1.0 / float(d_true)

        def layernorm(v, g, b):
            # Padded lanes of v are exactly zero (prepare_params invariant), so the sum
            # over d_pad lanes scaled by 1/d_true is already the true mean; only the
            # variance needs the mask. Padded g/b are zero -> padded output lanes stay 0.
            mean = jnp.sum(v, axis=-1, keepdims=True) * inv_d
            c = v - mean
            cm = c * lane_mask if needs_mask else c
            var = jnp.sum(cm * cm, axis=-1, keepdims=True) * inv_d
            return c * jax.lax.rsqrt(var + LN_EPS) * g + b

        y = jnp.maximum(y + bias, 0.0)           # Linear bias + ReLU
        y = layernorm(y, g1, b1)                 # LayerNorm inside ffn
        z = x_ref[...].astype(jnp.float32) + y   # residual in f32
        z = layernorm(z, g2, b2)                 # outer LayerNorm
        o_ref[...] = z.astype(o_ref.dtype)


# ------------------------------------------------------------------------------ wrapper
def prepare_params(params, *, compute_dtype=jnp.bfloat16, resident_budget=None):
    """One-time conversion to kernel-ready form (do this OUTSIDE the hot call path):
    pre-transpose W, pad the feature dim to a multiple of 128, cast the weight to the GEMM
    compute dtype, and pack bias / ln gammas / ln betas / lane mask into one (8, Dp) f32
    array. Padded lanes of everything are exactly zero (required by the kernel)."""
    d = params["w"].shape[0]
    d_pad = _round_up(d, 128)
    pad = d_pad - d

    wt = jnp.pad(params["w"].T, ((0, pad), (0, pad))).astype(compute_dtype)  # (Dp, Dp)

    def row(v):
        return jnp.pad(v.astype(jnp.float32), (0, pad)).reshape(1, d_pad)

    lane_mask = (jnp.arange(d_pad) < d).astype(jnp.float32).reshape(1, d_pad)
    packed = jnp.concatenate(
        [row(params["b"]), row(params["ln1_g"]), row(params["ln1_b"]),
         row(params["ln2_g"]), row(params["ln2_b"]), lane_mask,
         jnp.zeros((2, d_pad), jnp.float32)],
        axis=0)  # (8, Dp): bias, g1, b1, g2, b2, mask, padding rows

    if resident_budget is None:
        vmem_cap = _vmem_capacity_bytes()
        # ~40% of physical VMEM for the resident weight (≈51 MiB on 128-MiB v5e/v6e,
        # ≈25 MiB/TC on v7x) — also leaves room for x/out tiles and Mosaic scratch.
        resident_budget = min(int(0.40 * vmem_cap), 56 << 20)

    k_tile = _choose_k_tile(d_pad, np.dtype(compute_dtype).itemsize, resident_budget)
    return {"wt": wt, "packed": packed, "d_model": d, "d_pad": d_pad,
            "k_tile": k_tile, "compute_dtype": compute_dtype}


def std_feed_forward_network(src, prepared, *, row_tile=None, out_dtype=None):
    """src: (B, S, D). prepared: output of prepare_params. out_dtype: optional narrower
    output dtype (e.g. bf16) to halve the writeback stream."""
    B, S, D = src.shape
    assert D == prepared["d_model"]
    d_pad = prepared["d_pad"]
    k_tile = prepared["k_tile"]
    num_k = d_pad // k_tile
    cdt = prepared["compute_dtype"]
    out_dtype = src.dtype if out_dtype is None else jnp.dtype(out_dtype)

    x_item = jnp.dtype(src.dtype).itemsize
    o_item = jnp.dtype(out_dtype).itemsize
    w_item = jnp.dtype(cdt).itemsize

    # Accumulate K partials directly into the resident output block when it is f32.
    acc_in_out = (num_k > 1) and (out_dtype == jnp.float32)
    acc_row_bytes = d_pad * 4 if (num_k > 1 and not acc_in_out) else 0

    vmem_cap = _vmem_capacity_bytes()
    vmem_budget = int(0.85 * vmem_cap)

    N = B * S
    # Single-buffer a large resident weight (constant index map) to halve its footprint.
    w_bufs = 1 if (num_k == 1 and k_tile * d_pad * w_item > (4 << 20)) else 2

    if row_tile is None:
        # K-tiled: W^T is re-streamed from HBM once per row tile, so arithmetic intensity
        # on the weight stream == row_tile FLOP/byte; push it toward the compute/HBM
        # crossover (~512 on 128-MiB parts, ~384 within v7x's 64 MiB/TC).
        row_tile = 256 if num_k == 1 else (512 if vmem_cap >= (96 << 20) else 384)
    row_tile = max(8, _round_up(row_tile, 8))

    fixed = w_bufs * k_tile * d_pad * w_item + 2 * 8 * d_pad * 4
    per_row = 2 * d_pad * x_item + 2 * d_pad * o_item + acc_row_bytes
    while row_tile > 8 and fixed + row_tile * per_row > vmem_budget:
        row_tile -= 128 if row_tile > 128 else 8

    # Avoid the row pad + output slice HBM round trips when N already tiles cleanly.
    if N % 8 == 0 and N <= row_tile:
        row_tile = N
    elif N % row_tile != 0:
        for cand in range(row_tile, max(8, row_tile // 2) - 1, -8):
            if N % cand == 0:
                row_tile = cand
                break

    n_pad = _round_up(N, row_tile)
    x = src.reshape(N, D)
    if n_pad != N or d_pad != D:
        # Padded rows/lanes are zero; lane zeros are required by the in-kernel LayerNorm.
        x = jnp.pad(x, ((0, n_pad - N), (0, d_pad - D)))

    num_rows = n_pad // row_tile
    grid = (num_rows, num_k)  # rows parallel (megacore), K arbitrary (reduction, last)
    # TODO(synk): on v7x megacore prefer an even num_rows and a VMEM_SHARED/CMEM weight so
    # both TensorCores stay busy and do not each re-stream the full W^T.

    kernel = functools.partial(
        _ffn_kernel, d_true=D, k_tile=k_tile, num_k=num_k,
        compute_dtype=cdt, acc_in_out=acc_in_out, needs_mask=(d_pad != D))

    w_index_map = lambda i, k: (k, 0)
    if w_bufs == 1:
        try:
            w_spec = pl.BlockSpec((k_tile, d_pad), w_index_map,
                                  pipeline_mode=pl.Buffered(1))
        except Exception:  # older jax without pipeline_mode
            w_spec = pl.BlockSpec((k_tile, d_pad), w_index_map)
            w_bufs = 2
    else:
        w_spec = pl.BlockSpec((k_tile, d_pad), w_index_map)

    in_specs = [
        pl.BlockSpec((row_tile, d_pad), lambda i, k: (i, 0)),   # x rows (resident over k)
        w_spec,                                                 # W^T
        pl.BlockSpec((8, d_pad), lambda i, k: (0, 0)),          # packed per-channel params
    ]
    out_spec = pl.BlockSpec((row_tile, d_pad), lambda i, k: (i, 0))
    scratch = ([pltpu.VMEM((row_tile, d_pad), jnp.float32)]
               if (num_k > 1 and not acc_in_out) else [])

    needed = fixed + row_tile * per_row
    vmem_limit = int(min(0.9 * vmem_cap, max(needed + (8 << 20), 32 << 20)))

    out = pl.pallas_call(
        kernel,
        out_shape=jax.ShapeDtypeStruct((n_pad, d_pad), out_dtype),
        grid_spec=pltpu.PrefetchScalarGridSpec(
            num_scalar_prefetch=0,
            grid=grid,
            in_specs=in_specs,
            out_specs=out_spec,
            scratch_shapes=scratch),
        compiler_params=pltpu.CompilerParams(
            dimension_semantics=("parallel", "arbitrary"),
            vmem_limit_bytes=vmem_limit),
    )(x, prepared["wt"], prepared["packed"])

    if n_pad != N or d_pad != D:
        out = out[:N, :D]
    return out.reshape(B, S, D)


# ---------------------------------------------------------------------- init / reference
def init_params(key, d_model):
    kw, kb = jax.random.split(key)
    bound = 1.0 / jnp.sqrt(d_model)
    w = jax.random.uniform(kw, (d_model, d_model), jnp.float32, -bound, bound)  # (out, in)
    b = jax.random.uniform(kb, (d_model,), jnp.float32, -bound, bound)
    return {
        "w": w,
        "b": b,
        "ln1_g": jnp.ones((d_model,), jnp.float32),
        "ln1_b": jnp.zeros((d_model,), jnp.float32),
        "ln2_g": jnp.ones((d_model,), jnp.float32),
        "ln2_b": jnp.zeros((d_model,), jnp.float32),
    }


def _reference(src, params):
    x = src
    y = jnp.matmul(x, params["w"].T, precision=jax.lax.Precision.HIGHEST) + params["b"]
    y = jnp.maximum(y, 0.0)

    def ln(v, g, b):
        m = jnp.mean(v, axis=-1, keepdims=True)
        var = jnp.mean((v - m) ** 2, axis=-1, keepdims=True)
        return (v - m) * jax.lax.rsqrt(var + LN_EPS) * g + b

    y = ln(y, params["ln1_g"], params["ln1_b"])
    z = x + y
    return ln(z, params["ln2_g"], params["ln2_b"])


if __name__ == "__main__":
    key = jax.random.PRNGKey(0)
    k_param, k_x, k_param2, k_x2 = jax.random.split(key, 4)

    # ---- shape 1: (2, 8, 32) — lane padding 32 -> 128, weight fully resident ----------
    B, S, D = 2, 8, 32
    params = init_params(k_param, D)
    src = jax.random.normal(k_x, (B, S, D), jnp.float32)
    ref = _reference(src, params)

    prep_f32 = prepare_params(params, compute_dtype=jnp.float32)
    out_f32 = jax.block_until_ready(std_feed_forward_network(src, prep_f32))
    assert out_f32.shape == (B, S, D)
    assert jnp.allclose(out_f32, ref, atol=2e-3, rtol=2e-3), "f32 path mismatch vs reference"

    prep_bf16 = prepare_params(params, compute_dtype=jnp.bfloat16)
    out_bf16 = jax.block_until_ready(std_feed_forward_network(src, prep_bf16))
    assert out_bf16.shape == (B, S, D)
    assert jnp.allclose(out_bf16, ref, atol=5e-2, rtol=5e-2), "bf16 path mismatch vs reference"

    # ---- shape 2: (2, 8, 300) with a tiny forced residency budget -> K-tiled paths ----
    D2 = 300
    params2 = init_params(k_param2, D2)
    src2 = jax.random.normal(k_x2, (2, 8, D2), jnp.float32)
    ref2 = _reference(src2, params2)

    # f32 output -> accumulate directly into the resident output block (no scratch).
    prep_kt = prepare_params(params2, compute_dtype=jnp.float32, resident_budget=256 << 10)
    assert prep_kt["d_pad"] // prep_kt["k_tile"] > 1, "expected a K-tiled configuration"
    out_kt = jax.block_until_ready(std_feed_forward_network(src2, prep_kt))
    assert out_kt.shape == (2, 8, D2)
    assert jnp.allclose(out_kt, ref2, atol=2e-3, rtol=2e-3), "K-tiled f32 path mismatch"

    # bf16 output -> scratch-accumulator path + narrower writeback stream.
    prep_kt16 = prepare_params(params2, compute_dtype=jnp.bfloat16, resident_budget=256 << 10)
    out_kt16 = std_feed_forward_network(src2, prep_kt16, out_dtype=jnp.bfloat16)
    out_kt16 = jax.block_until_ready(out_kt16).astype(jnp.float32)
    assert jnp.allclose(out_kt16, ref2, atol=1e-1, rtol=1e-1), "K-tiled bf16 path mismatch"

    print("KERNEL_OK")
</pallas_src>

<mosaic_0001>
module attributes {stable_mosaic.version = 11 : i64} {
  func.func @_ffn_kernel(%arg0: i32, %arg1: i32, %arg2: memref<16x128xf32, #tpu.memory_space<vmem>>, %arg3: memref<128x128xf32, #tpu.memory_space<vmem>>, %arg4: memref<8x128xf32, #tpu.memory_space<vmem>>, %arg5: memref<16x128xf32, #tpu.memory_space<vmem>>) attributes {dimension_semantics = [#tpu.dimension_semantics<parallel>, #tpu.dimension_semantics<arbitrary>], iteration_bounds = array<i64: 1, 1>, scalar_prefetch = 0 : i64, scratch_operands = 0 : i64, tpu.core_type = #tpu.core_type<tc>, window_params = [{transform_indices = @transform_0, window_bounds = array<i64: 16, 128>}, {transform_indices = @transform_1, window_bounds = array<i64: 128, 128>}, {pipeline_mode = #tpu.pipeline_mode<synchronous>, transform_indices = @transform_2, window_bounds = array<i64: 8, 128>}, {transform_indices = @transform_3, window_bounds = array<i64: 16, 128>}]} {
    %c0 = arith.constant 0 : index
    %c0_0 = arith.constant 0 : index
    %0 = vector.load %arg2[%c0, %c0_0] : memref<16x128xf32, #tpu.memory_space<vmem>>, vector<16x128xf32>
    %c0_1 = arith.constant 0 : index
    %c0_2 = arith.constant 0 : index
    %1 = vector.load %arg3[%c0_1, %c0_2] : memref<128x128xf32, #tpu.memory_space<vmem>>, vector<128x128xf32>
    %cst = arith.constant dense<0.000000e+00> : vector<16x128xf32>
    %2 = tpu.matmul %0, %1, %cst {dimension_numbers = #tpu.dot_dimension_numbers<[1], [0], [0], [1], [0, 0, 1, 1], [], []>} : vector<16x128xf32>, vector<128x128xf32>, vector<16x128xf32> -> vector<16x128xf32>
    %c0_i32 = arith.constant 0 : i32
    %3 = arith.cmpi eq, %arg1, %c0_i32 : i32
    %4 = arith.extui %3 : i1 to i32
    %c0_i32_3 = arith.constant 0 : i32
    %5 = arith.cmpi ne, %4, %c0_i32_3 : i32
    scf.if %5 {
      %c0_4 = arith.constant 0 : index
      %c0_5 = arith.constant 0 : index
      %6 = vector.load %arg4[%c0_4, %c0_5] : memref<8x128xf32, #tpu.memory_space<vmem>>, vector<1x128xf32>
      %c1 = arith.constant 1 : index
      %c0_6 = arith.constant 0 : index
      %7 = vector.load %arg4[%c1, %c0_6] : memref<8x128xf32, #tpu.memory_space<vmem>>, vector<1x128xf32>
      %c2 = arith.constant 2 : index
      %c0_7 = arith.constant 0 : index
      %8 = vector.load %arg4[%c2, %c0_7] : memref<8x128xf32, #tpu.memory_space<vmem>>, vector<1x128xf32>
      %c3 = arith.constant 3 : index
      %c0_8 = arith.constant 0 : index
      %9 = vector.load %arg4[%c3, %c0_8] : memref<8x128xf32, #tpu.memory_space<vmem>>, vector<1x128xf32>
      %c4 = arith.constant 4 : index
      %c0_9 = arith.constant 0 : index
      %10 = vector.load %arg4[%c4, %c0_9] : memref<8x128xf32, #tpu.memory_space<vmem>>, vector<1x128xf32>
      %c5 = arith.constant 5 : index
      %c0_10 = arith.constant 0 : index
      %11 = vector.load %arg4[%c5, %c0_10] : memref<8x128xf32, #tpu.memory_space<vmem>>, vector<1x128xf32>
      %12 = vector.broadcast %6 : vector<1x128xf32> to vector<16x128xf32>
      %13 = arith.addf %2, %12 : vector<16x128xf32>
      %cst_11 = arith.constant 0.000000e+00 : f32
      %14 = vector.broadcast %cst_11 : f32 to vector<16x128xf32>
      %15 = arith.maximumf %13, %14 : vector<16x128xf32>
      %cst_12 = arith.constant dense<0.000000e+00> : vector<16xf32>
      %16 = vector.multi_reduction <add>, %15, %cst_12 [1] : vector<16x128xf32> to vector<16xf32>
      %17 = vector.shape_cast %16 : vector<16xf32> to vector<16x1xf32>
      %cst_13 = arith.constant 3.125000e-02 : f32
      %18 = vector.broadcast %cst_13 : f32 to vector<16x1xf32>
      %19 = arith.mulf %17, %18 : vector<16x1xf32>
      %20 = vector.broadcast %19 : vector<16x1xf32> to vector<16x128xf32>
      %21 = arith.subf %15, %20 : vector<16x128xf32>
      %22 = vector.broadcast %11 : vector<1x128xf32> to vector<16x128xf32>
      %23 = arith.mulf %21, %22 : vector<16x128xf32>
      %24 = arith.mulf %23, %23 : vector<16x128xf32>
      %cst_14 = arith.constant dense<0.000000e+00> : vector<16xf32>
      %25 = vector.multi_reduction <add>, %24, %cst_14 [1] : vector<16x128xf32> to vector<16xf32>
      %26 = vector.shape_cast %25 : vector<16xf32> to vector<16x1xf32>
      %cst_15 = arith.constant 3.125000e-02 : f32
      %27 = vector.broadcast %cst_15 : f32 to vector<16x1xf32>
      %28 = arith.mulf %26, %27 : vector<16x1xf32>
      %cst_16 = arith.constant 9.99999974E-6 : f32
      %29 = vector.broadcast %cst_16 : f32 to vector<16x1xf32>
      %30 = arith.addf %28, %29 : vector<16x1xf32>
      %31 = math.rsqrt %30 : vector<16x1xf32>
      %32 = vector.broadcast %31 : vector<16x1xf32> to vector<16x128xf32>
      %33 = arith.mulf %21, %32 : vector<16x128xf32>
      %34 = vector.broadcast %7 : vector<1x128xf32> to vector<16x128xf32>
      %35 = arith.mulf %33, %34 : vector<16x128xf32>
      %36 = vector.broadcast %8 : vector<1x128xf32> to vector<16x128xf32>
      %37 = arith.addf %35, %36 : vector<16x128xf32>
      %c0_17 = arith.constant 0 : index
      %c0_18 = arith.constant 0 : index
      %38 = vector.load %arg2[%c0_17, %c0_18] : memref<16x128xf32, #tpu.memory_space<vmem>>, vector<16x128xf32>
      %39 = arith.addf %38, %37 : vector<16x128xf32>
      %cst_19 = arith.constant dense<0.000000e+00> : vector<16xf32>
      %40 = vector.multi_reduction <add>, %39, %cst_19 [1] : vector<16x128xf32> to vector<16xf32>
      %41 = vector.shape_cast %40 : vector<16xf32> to vector<16x1xf32>
      %cst_20 = arith.constant 3.125000e-02 : f32
      %42 = vector.broadcast %cst_20 : f32 to vector<16x1xf32>
      %43 = arith.mulf %41, %42 : vector<16x1xf32>
      %44 = vector.broadcast %43 : vector<16x1xf32> to vector<16x128xf32>
      %45 = arith.subf %39, %44 : vector<16x128xf32>
      %46 = vector.broadcast %11 : vector<1x128xf32> to vector<16x128xf32>
      %47 = arith.mulf %45, %46 : vector<16x128xf32>
      %48 = arith.mulf %47, %47 : vector<16x128xf32>
      %cst_21 = arith.constant dense<0.000000e+00> : vector<16xf32>
      %49 = vector.multi_reduction <add>, %48, %cst_21 [1] : vector<16x128xf32> to vector<16xf32>
      %50 = vector.shape_cast %49 : vector<16xf32> to vector<16x1xf32>
      %cst_22 = arith.constant 3.125000e-02 : f32
      %51 = vector.broadcast %cst_22 : f32 to vector<16x1xf32>
      %52 = arith.mulf %50, %51 : vector<16x1xf32>
      %cst_23 = arith.constant 9.99999974E-6 : f32
      %53 = vector.broadcast %cst_23 : f32 to vector<16x1xf32>
      %54 = arith.addf %52, %53 : vector<16x1xf32>
      %55 = math.rsqrt %54 : vector<16x1xf32>
      %56 = vector.broadcast %55 : vector<16x1xf32> to vector<16x128xf32>
      %57 = arith.mulf %45, %56 : vector<16x128xf32>
      %58 = vector.broadcast %9 : vector<1x128xf32> to vector<16x128xf32>
      %59 = arith.mulf %57, %58 : vector<16x128xf32>
      %60 = vector.broadcast %10 : vector<1x128xf32> to vector<16x128xf32>
      %61 = arith.addf %59, %60 : vector<16x128xf32>
      %c0_24 = arith.constant 0 : index
      %c0_25 = arith.constant 0 : index
      %62 = vector.load %arg5[%c0_24, %c0_25] : memref<16x128xf32, #tpu.memory_space<vmem>>, vector<16x128xf32>
      tpu.vector_store %arg5[%c0_24, %c0_25], %61 {strides = array<i32>} : memref<16x128xf32, #tpu.memory_space<vmem>>, vector<16x128xf32>,
    } else {
    }
    return
  }
  func.func @transform_0(%arg0: i32, %arg1: i32) -> (i32, i32) {
    %c0_i32 = arith.constant 0 : i32
    %c0_i32_0 = arith.constant 0 : i32
    return %arg0, %c0_i32 : i32, i32
  }
  func.func @transform_1(%arg0: i32, %arg1: i32) -> (i32, i32) {
    %c0_i32 = arith.constant 0 : i32
    %c0_i32_0 = arith.constant 0 : i32
    return %arg1, %c0_i32 : i32, i32
  }
  func.func @transform_2(%arg0: i32, %arg1: i32) -> (i32, i32) {
    %c0_i32 = arith.constant 0 : i32
    %c0_i32_0 = arith.constant 0 : i32
    %c0_i32_1 = arith.constant 0 : i32
    return %c0_i32, %c0_i32_0 : i32, i32
  }
  func.func @transform_3(%arg0: i32, %arg1: i32) -> (i32, i32) {
    %c0_i32 = arith.constant 0 : i32
    %c0_i32_0 = arith.constant 0 : i32
    return %arg0, %c0_i32 : i32, i32
  }
}

</mosaic_0001>

<bundles_post_ra>
// kernel: tpu_custom_call.1
= control target key start
LH: loop header
LB: loop body
LE: loop exit
PB: predicated region body
PF: predicated region fallthrough
CT: control target
= control target key end

     0   :  { %8 = vsyncpa [#allocation3], 0  ;;  %s556_s0 = inlined_call_operand.hbm [shape: f32[16,128], index: 0, kind: input, shape index: {}]   ;;  %s557_s1 = inlined_call_operand.hbm [shape: f32[128,128], index: 1, kind: input, shape index: {}]   ;;  %s558_s2 = inlined_call_operand.hbm [shape: f32[8,128], index: 2, kind: input, shape index: {}]   ;;  %s559_s3 = inlined_call_operand.hbm [shape: f32[16,128], index: 3, kind: output, shape index: {}]  }
   0x1   :  { %9 = vsyncpa [#allocation6], 0 }
   0x2   :  { %10 = vsyncpa [#allocation4], 0  ;;  %s462_s12 = smov [#allocation5]   ;;  %s463_s14 = smov [#allocation2]  }
   0x3   :  { %s28_s13 = sshll.u32 %s462_s12, 4  ;;  %s16_s15 = sshll.u32 %s463_s14, 4  ;;  %s29_s13 = int_to_ptr.vmem [resolvable:$true] %s28_s13  ;;  %s488_s15 = int_to_ptr.vmem [resolvable:$true] %s16_s15 }
   0x4   :  { %s368_s18 = scalar_lea.hbm %s557_s1, 2048 }
   0x5   :  { %p369_p0 = scmp.ne.s32.totalorder %s557_s1, %s368_s18  ;;  %p372_p1 = scmp.lt.u32.totalorder %s368_s18, %s557_s1 }
   0x7   :  { %p374_p2 = pnand %p372_p1, %p369_p0 }
   0x9   :  { %377 = shalt.err (!%p374_p2)
}
   0xa   :  { %s378_s23 = scalar_lea.vmem %s29_s13, 2048  ;;  %p383_p4 = scmp.lt.s32.totalorder %s29_s13, %s29_s13 }
   0xb   :  { %p379_p3 = scmp.ne.s32.totalorder %s29_s13, %s378_s23  ;;  %p384_p5 = scmp.lt.s32.totalorder %s378_s23, %s378_s23 }
   0xd   :  { %p385_p6 = por %p384_p5, %p383_p4 }
   0xf   :  { %p386_p7 = pnand %p385_p6, %p379_p3 }
  0x11   :  { %389 = shalt.err (!%p386_p7)
}
  0x12   :  { %s464_s24 = smov 128   ;;  %s465_s25 = smov 8  }
  0x13   :  { %34 = dma.hbm_to_vmem [thread:$0]  %s557_s1, 2048, %s29_s13, [#allocation6], %s464_s24, %s464_s24, %s465_s25  }
  0x14   :  { %s390_s30 = scalar_lea.hbm %s556_s0, 256 }
  0x15   :  { %p391_p8 = scmp.ne.s32.totalorder %s556_s0, %s390_s30  ;;  %p394_p9 = scmp.lt.u32.totalorder %s390_s30, %s556_s0 }
  0x17   :  { %p396_p10 = pnand %p394_p9, %p391_p8 }
  0x19   :  { %399 = shalt.err (!%p396_p10)
}
  0x1a   :  { %s400_s8 = scalar_lea.vmem %s488_s15, 256  ;;  %p405_p12 = scmp.lt.s32.totalorder %s488_s15, %s488_s15 }
  0x1b   :  { %p401_p11 = scmp.ne.s32.totalorder %s488_s15, %s400_s8  ;;  %p406_p13 = scmp.lt.s32.totalorder %s400_s8, %s400_s8 }
  0x1d   :  { %p407_p0 = por %p406_p13, %p405_p12 }
  0x1f   :  { %p408_p1 = pnand %p407_p0, %p401_p11 }
  0x21   :  { %411 = shalt.err (!%p408_p1)
}
  0x22   :  { %22 = dma.hbm_to_vmem [thread:$0]  %s556_s0, 256, %s488_s15, [#allocation3], %s464_s24, %s464_s24, %s465_s25  }
  0x23   :  { %s466_s10 = smov [#allocation7]   ;;  %s412_s14 = scalar_lea.hbm %s558_s2, 128 }
  0x24   :  { %s41_s11 = sshll.u32 %s466_s10, 4  ;;  %p413_p2 = scmp.ne.s32.totalorder %s558_s2, %s412_s14  ;;  %s42_s11 = int_to_ptr.vmem [resolvable:$true] %s41_s11 }
  0x25   :  { %p416_p3 = scmp.lt.u32.totalorder %s412_s14, %s558_s2 }
  0x27   :  { %p418_p4 = pnand %p416_p3, %p413_p2 }
  0x29   :  { %421 = shalt.err (!%p418_p4)
}
  0x2a   :  { %s422_s20 = scalar_lea.vmem %s42_s11, 128  ;;  %p427_p6 = scmp.lt.s32.totalorder %s42_s11, %s42_s11 }
  0x2b   :  { %p423_p5 = scmp.ne.s32.totalorder %s42_s11, %s422_s20  ;;  %p428_p7 = scmp.lt.s32.totalorder %s422_s20, %s422_s20 }
  0x2d   :  { %p429_p8 = por %p428_p7, %p427_p6 }
  0x2f   :  { %p430_p9 = pnand %p429_p8, %p423_p5 }
  0x31   :  { %433 = shalt.err (!%p430_p9)
}
  0x32   :  { %44 = dma.hbm_to_vmem [thread:$0]  %s558_s2, 128, %s42_s11, [#allocation6]  }
  0x33   :  { %456 = dma.done.wait [#allocation3], 256  }
  0x34   :  { %457 = vsyncadd [#allocation3], 4294967040 }
  0x35   :  { %458 = dma.done.wait [#allocation6], 2176  }
  0x36   :  { %459 = vsyncadd [#allocation6], 4294965120  ;;  %v56_v0 = vld [vmem:[#allocation5] sm:$0xff]  ;;  %v57_v1 = vld [vmem:[#allocation5 + $0x8] sm:$0xff]  ;;  %s467_s2 = smov [#allocation8]  }
  0x37   :  { %v58_v2 = vld [vmem:[#allocation5 + $0x10] sm:$0xff]  ;;  %v322_v3 = vpack.c.bf16 %v57_v1, %v56_v0  ;;  %v59_v4 = vld [vmem:[#allocation5 + $0x18] sm:$0xff]  ;;  %v60_v6 = vld [vmem:[#allocation5 + $0x20] sm:$0xff]  ;;  %s250_s21 = sshll.u32 %s467_s2, 4  ;;  %s251_s21 = int_to_ptr.vmem [resolvable:$true] %s250_s21 }
  0x38   :  { %v326_v5 = vpack.c.bf16 %v59_v4, %v58_v2  ;;  %v61_v7 = vld [vmem:[#allocation5 + $0x28] sm:$0xff]  ;;  %v537_v9 = vld [vmem:[#allocation2] sm:$0xff]  ;;  %v63_v11 = vld [vmem:[#allocation5 + $0x38] sm:$0xff]  ;;  %s434_s22 = scalar_lea.vmem %s251_s21, 256  ;;  %p439_p11 = scmp.lt.s32.totalorder %s251_s21, %s251_s21 }
  0x39   :  { %323 = vmatprep.subr.bf16.mxu0 %v322_v3  ;;  %v330_v8 = vpack.c.bf16 %v61_v7, %v60_v6  ;;  %v62_v10 = vld [vmem:[#allocation5 + $0x30] sm:$0xff]  ;;  %319 = vmatprep.mubr.f32.mxu0 %v537_v9  ;;  %v64_v13 = vld [vmem:[#allocation5 + $0x40] sm:$0xff]  ;;  %v65_v14 = vld [vmem:[#allocation5 + $0x48] sm:$0xff]  ;;  %p435_p10 = scmp.ne.s32.totalorder %s251_s21, %s434_s22  ;;  %p440_p12 = scmp.lt.s32.totalorder %s434_s22, %s434_s22 }
  0x3a   :  { %325 = vmatpush3.bf16.msra.mxu0 %v322_v3  ;;  %v334_v12 = vpack.c.bf16 %v63_v11, %v62_v10  ;;  %v338_v15 = vpack.c.bf16 %v65_v14, %v64_v13  ;;  %v66_v16 = vld [vmem:[#allocation5 + $0x50] sm:$0xff]  ;;  %v67_v17 = vld [vmem:[#allocation5 + $0x58] sm:$0xff]  ;;  %v68_v19 = vld [vmem:[#allocation5 + $0x60] sm:$0xff] }
  0x3b   :  { %327 = vmatprep.subr.bf16.mxu0 %v326_v5  ;;  %v342_v18 = vpack.c.bf16 %v67_v17, %v66_v16  ;;  %v69_v20 = vld [vmem:[#allocation5 + $0x68] sm:$0xff]  ;;  %v70_v22 = vld [vmem:[#allocation5 + $0x70] sm:$0xff]  ;;  %v71_v23 = vld [vmem:[#allocation5 + $0x78] sm:$0xff]  ;;  %p441_p13 = por %p440_p12, %p439_p11 }
  0x3c   :  { %v346_v21 = vpack.c.bf16 %v69_v20, %v68_v19  ;;  %v350_v24 = vpack.c.bf16 %v71_v23, %v70_v22  ;;  %v55_v25 = vld [vmem:[#allocation2 + $0x8] sm:$0xff]  ;;  %v263_v26 = vld [vmem:[#allocation7] ss:$0 sm:$0xff]  ;;  %v264_v35 = vld [vmem:[#allocation7 + $0x5] ss:$0 sm:$0xff] }
  0x3d   :  { %v265_v51 = vld [vmem:[#allocation7 + $0x1] ss:$0 sm:$0xff]  ;;  %v266_v53 = vld [vmem:[#allocation7 + $0x2] ss:$0 sm:$0xff]  ;;  %v268_v17 = vld [vmem:[#allocation7 + $0x4] ss:$0 sm:$0xff]  ;;  %p442_p0 = pnand %p441_p13, %p435_p10 }
  0x3e   :  { %329 = vmatpush3.bf16.msra.mxu0 %v326_v5 }
  0x3f   :  { %331 = vmatprep.subr.bf16.mxu0 %v330_v8 }
  0x42   :  { %333 = vmatpush3.bf16.msra.mxu0 %v330_v8 }
  0x43   :  { %335 = vmatprep.subr.bf16.mxu0 %v334_v12 }
  0x46   :  { %337 = vmatpush3.bf16.msra.mxu0 %v334_v12 }
  0x47   :  { %339 = vmatprep.subr.bf16.mxu0 %v338_v15 }
  0x4a   :  { %341 = vmatpush3.bf16.msra.mxu0 %v338_v15  ;;  %v267_v15 = vld [vmem:[#allocation7 + $0x3] ss:$0 sm:$0xff] }
  0x4b   :  { %343 = vmatprep.subr.bf16.mxu0 %v342_v18 }
  0x4e   :  { %345 = vmatpush3.bf16.msra.mxu0 %v342_v18 }
  0x4f   :  { %347 = vmatprep.subr.bf16.mxu0 %v346_v21 }
  0x52   :  { %349 = vmatpush3.bf16.msra.mxu0 %v346_v21 }
  0x53   :  { %351 = vmatprep.subr.bf16.mxu0 %v350_v24 }
  0x56   :  { %353 = vmatpush3.bf16.msra.mxu0 %v350_v24 }
  0x59   :  { %320 = vmatmul.mubr.f32.vlgmr.msra.gmra.mrb[0].mxu0 %v55_v25 }
 0x12c   :  { %v321_v27 = vpop.f32.mrb[0].mxu0 }
 0x12d   :  { %v152_v28 = vpop.f32.mrb[1].mxu0  ;;  %v158_v30 = vadd.f32 %v321_v27, %v263_v26 }
 0x12e   :  { %v153_v29 = vadd.f32 %v263_v26, %v152_v28 }
 0x12f   :  { %v162_v32 = vmax.f32 %v158_v30, 0.0 }
 0x130   :  { %v161_v31 = vmax.f32 %v153_v29, 0.0 }
 0x132   :  { %163 = vadd.xlane.f32.xlu0 %v161_v31 }
 0x136   :  { %165 = vadd.xlane.f32.xlu0 %v162_v32 }
 0x1bf   :  { %v164_v33 = vpop.xlane.xlu0 %163 }
 0x1c0   :  { %v167_v34 = vmul.f32 0.03125, %v164_v33 }
 0x1c2   :  { %v169_v36 = vsub.f32 %v161_v31, %v167_v34 }
 0x1c3   :  { %v166_v37 = vpop.xlane.xlu0 %165 }
 0x1c4   :  { %v168_v38 = vmul.f32 0.03125, %v166_v37  ;;  %v175_v39 = vmul.f32 %v264_v35, %v169_v36 }
 0x1c6   :  { %v170_v40 = vsub.f32 %v162_v32, %v168_v38  ;;  %v177_v41 = vmul.f32 %v175_v39, %v175_v39 }
 0x1c8   :  { %179 = vadd.xlane.f32.xlu1 %v177_v41  ;;  %v176_v42 = vmul.f32 %v264_v35, %v170_v40 }
 0x1ca   :  { %v178_v43 = vmul.f32 %v176_v42, %v176_v42 }
 0x1cc   :  { %181 = vadd.xlane.f32.xlu1 %v178_v43 }
 0x255   :  { %v180_v44 = vpop.xlane.xlu1 %179 }
 0x256   :  { %v183_v45 = vmul.f32 0.03125, %v180_v44 }
 0x258   :  { %v185_v46 = vadd.f32 1e-05, %v183_v45 }
 0x259   :  { %v182_v47 = vpop.xlane.xlu1 %181 }
 0x25a   :  { %360 = vrsqrt.f32 %v185_v46  ;;  %v184_v48 = vmul.f32 0.03125, %v182_v47 }
 0x25c   :  { %v186_v49 = vadd.f32 1e-05, %v184_v48 }
 0x25e   :  { %362 = vrsqrt.f32 %v186_v49 }
 0x264   :  { %v361_v50 = vpop.eup %360 }
 0x265   :  { %v189_v52 = vmul.f32 %v361_v50, %v169_v36 }
 0x267   :  { %v195_v54 = vmul.f32 %v265_v51, %v189_v52 }
 0x268   :  { %v363_v55 = vpop.eup %362 }
 0x269   :  { %v201_v56 = vadd.f32 %v266_v53, %v195_v54  ;;  %v190_v57 = vmul.f32 %v363_v55, %v170_v40 }
 0x26b   :  { %v205_v58 = vadd.f32 %v201_v56, %v537_v9  ;;  %v196_v59 = vmul.f32 %v265_v51, %v190_v57 }
 0x26d   :  { %207 = vadd.xlane.f32.xlu0 %v205_v58  ;;  %v202_v60 = vadd.f32 %v266_v53, %v196_v59 }
 0x26f   :  { %v206_v61 = vadd.f32 %v202_v60, %v55_v25 }
 0x271   :  { %209 = vadd.xlane.f32.xlu1 %v206_v61 }
 0x2fa   :  { %v208_v62 = vpop.xlane.xlu0 %207 }
 0x2fb   :  { %v211_v63 = vmul.f32 0.03125, %v208_v62 }
 0x2fd   :  { %v213_v0 = vsub.f32 %v205_v58, %v211_v63 }
 0x2fe   :  { %v210_v1 = vpop.xlane.xlu1 %209 }
 0x2ff   :  { %v212_v2 = vmul.f32 0.03125, %v210_v1  ;;  %v215_v3 = vmul.f32 %v264_v35, %v213_v0 }
 0x301   :  { %v214_v4 = vsub.f32 %v206_v61, %v212_v2  ;;  %v217_v5 = vmul.f32 %v215_v3, %v215_v3 }
 0x303   :  { %219 = vadd.xlane.f32.xlu0 %v217_v5  ;;  %v216_v6 = vmul.f32 %v264_v35, %v214_v4 }
 0x305   :  { %v218_v7 = vmul.f32 %v216_v6, %v216_v6 }
 0x307   :  { %221 = vadd.xlane.f32.xlu1 %v218_v7 }
 0x390   :  { %v220_v8 = vpop.xlane.xlu0 %219 }
 0x391   :  { %v223_v10 = vmul.f32 0.03125, %v220_v8 }
 0x393   :  { %v225_v9 = vadd.f32 1e-05, %v223_v10 }
 0x394   :  { %v222_v11 = vpop.xlane.xlu1 %221 }
 0x395   :  { %364 = vrsqrt.f32 %v225_v9  ;;  %v224_v12 = vmul.f32 0.03125, %v222_v11 }
 0x397   :  { %v226_v13 = vadd.f32 1e-05, %v224_v12 }
 0x399   :  { %366 = vrsqrt.f32 %v226_v13 }
 0x39f   :  { %v365_v14 = vpop.eup %364 }
 0x3a0   :  { %v229_v16 = vmul.f32 %v365_v14, %v213_v0 }
 0x3a2   :  { %v235_v18 = vmul.f32 %v267_v15, %v229_v16 }
 0x3a3   :  { %v367_v19 = vpop.eup %366 }
 0x3a4   :  { %v230_v20 = vmul.f32 %v367_v19, %v214_v4  ;;  %v241_v21 = vadd.f32 %v268_v17, %v235_v18 }
 0x3a6   :  { %v236_v22 = vmul.f32 %v267_v15, %v230_v20  ;;  %243 = vst [vmem:[#allocation8] sm:$0xff] %v241_v21 }
 0x3a8   :  { %v242_v23 = vadd.f32 %v268_v17, %v236_v22 }
 0x3aa   :  { %244 = vst [vmem:[#allocation8 + $0x8] sm:$0xff] %v242_v23 }
 0x3ab   :  { %445 = shalt.err (!%p442_p0)
}
 0x3ac   :  { %s446_s27 = scalar_lea.hbm %s559_s3, 256 }
 0x3ad   :  { %p447_p1 = scmp.ne.s32.totalorder %s559_s3, %s446_s27  ;;  %p450_p2 = scmp.lt.u32.totalorder %s446_s27, %s559_s3 }
 0x3af   :  { %p452_p3 = pnand %p450_p2, %p447_p1 }
 0x3b1   :  { %455 = shalt.err (!%p452_p3)
}
 0x3b2   :  { %256 = dma.vmem_to_hbm [thread:$0]  %s251_s21, 256, %s559_s3, [#allocation4], %s464_s24, %s464_s24, %s465_s25  }
 0x3b3   :  { %460 = dma.done.wait [#allocation4], 256  }
 0x3b4   :  { %461 = vsyncadd [#allocation4], 4294967040 }
 0x3b5   :  { %260 = vsyncpa [#allocation3], 1 }
 0x3b6   :  { %261 = vsyncpa [#allocation6], 1 }
 0x3b7   :  { %262 = vsyncpa [#allocation4], 1 }

</bundles_post_ra>
